<compile_context>
chip_gen: v5e
topology: v5e:2x2
jax: 0.10.0
libtpu: 0.0.40
codegen_flags: <defaults>
</compile_context>

<pallas_src>
import math

import jax
import jax.numpy as jnp
from jax import lax
from jax.experimental import pallas as pl
from jax.experimental.pallas import tpu as pltpu

_EPS = 1e-12            # torch.nn.functional.normalize default eps
_EPS2 = _EPS * _EPS     # max(sqrt(s), eps) == sqrt(max(s, eps^2))


def _cdiv(a, b):
    return -(-a // b)


def _round_up(a, b):
    return _cdiv(a, b) * b


# ----------------------------- kernels ------------------------------------- #

def _kernel_direct(x_ref, pn_ref, o_ref):
    """Emit logits block [tile_b, N]; normalization applied as per-row output scale."""
    x = x_ref[...]                                   # native dtype (bf16 or f32)
    pn = pn_ref[...]                                 # temp * unit-normalized prototypes
    xf = x.astype(jnp.float32)
    sumsq = jnp.sum(xf * xf, axis=-1, keepdims=True)                 # [tile_b, 1] f32
    scale = lax.rsqrt(jnp.maximum(sumsq, _EPS2))                     # [tile_b, 1]
    x_mm = x if x.dtype == pn.dtype else xf          # bf16 goes straight to the MXU
    raw = lax.dot_general(x_mm, pn,
                          dimension_numbers=(((1,), (1,)), ((), ())),
                          preferred_element_type=jnp.float32)        # [tile_b, N]
    o_ref[...] = (raw * scale).astype(o_ref.dtype)


def _kernel_transposed(x_ref, pn_ref, ot_ref):
    """Emit lane-dense transposed logits block [N, tile_b] (for small N).

    The per-row scale must be per *output column* here; it is produced directly
    in [1, tile_b] lane-dense layout via a tiny ones-matmul (MXU, no XLU
    transpose / relayout of a skinny vector needed).
    """
    x = x_ref[...]
    pn = pn_ref[...]
    xf = x.astype(jnp.float32)
    xsq = xf * xf                                                    # [tile_b, D] f32
    d = xsq.shape[1]
    ones = jnp.ones((8, d), jnp.float32)             # 8 rows: native sublane count
    sumsq8 = lax.dot_general(ones, xsq,
                             dimension_numbers=(((1,), (1,)), ((), ())),
                             preferred_element_type=jnp.float32)     # [8, tile_b]
    scale_t = lax.rsqrt(jnp.maximum(sumsq8[0:1, :], _EPS2))          # [1, tile_b]
    x_mm = x if x.dtype == pn.dtype else xf
    raw = lax.dot_general(pn, x_mm,
                          dimension_numbers=(((1,), (1,)), ((), ())),
                          preferred_element_type=jnp.float32)        # [N, tile_b]
    ot_ref[...] = (raw * scale_t).astype(ot_ref.dtype)


# ----------------------------- wrapper -------------------------------------- #

def _vmem_capacity_bytes():
    try:
        info = pltpu.get_tpu_info()
        cap = int(getattr(info, "vmem_capacity_bytes", 0) or 0)
        if cap > 0:
            return cap
    except Exception:
        pass
    return 64 << 20   # conservative fallback (v7x per-TensorCore VMEM)


def _choose_tile_b(B, D, itemsize, vmem_cap):
    """Pick a (8,128)-aligned batch tile: ~4 MiB of x per step, >= 2 (ideally 4) steps."""
    if B <= 128:
        return B                                   # single full-extent block
    per_row = D * itemsize
    step_budget = 4 << 20                          # measured sweet spot for mem-bound tiles
    buf_budget = max(128 * per_row, vmem_cap // 6) # keep double-buffered x well inside VMEM
    cap_rows = max(128, (min(step_budget, buf_budget) // per_row) // 128 * 128)
    tile_b = min(cap_rows, 4096)
    # v7x megacore: give both TensorCores work (aim for >= 4 grid steps; never < 128 rows)
    tile_b = min(tile_b, max(128, _round_up(_cdiv(B, 4), 128)))
    return tile_b


def cosine_classifier(x, proto, temp, *, tile_b=None):
    """Returns temp * (normalize(x) @ normalize(proto).T) as [B, N] float32."""
    x = jnp.asarray(x)
    proto = jnp.asarray(proto)
    B, D = x.shape
    N, D2 = proto.shape
    assert D == D2, "feature dims of x and proto must match"

    if x.dtype not in (jnp.bfloat16, jnp.float32):
        x = x.astype(jnp.float32)

    # One-time prototype normalization with the temperature folded in (hoisted out
    # of the grid; tiny [N, D] work vs streaming x).
    p = proto.astype(jnp.float32)
    p_inv = lax.rsqrt(jnp.maximum(jnp.sum(p * p, axis=-1, keepdims=True), _EPS2))
    pn = (p * p_inv) * jnp.asarray(temp, jnp.float32)
    if x.dtype == jnp.bfloat16:
        pn = pn.astype(jnp.bfloat16)              # bf16 features go straight to the MXU

    vmem_cap = _vmem_capacity_bytes()
    itemsize = jnp.dtype(x.dtype).itemsize
    if tile_b is None:
        tile_b = _choose_tile_b(B, D, itemsize, vmem_cap)
    if tile_b >= B:
        tile_b = B                                 # full-extent block: always legal
    else:
        tile_b = max(128, (tile_b // 128) * 128)   # (8,128)-aligned partial blocks
        if tile_b >= B:
            tile_b = B
    grid_b = _cdiv(B, tile_b)                      # no jnp.pad: trailing block is masked

    transposed_out = N < 128                       # lane-dense output for small-N heads

    # Generation-aware explicit VMEM budget (<= 3/4 of physical: ~48 MiB v7x, 96 MiB v5e/v6e).
    vmem_need = (2 * tile_b * D * itemsize               # double-buffered x stream
                 + 2 * N * D * pn.dtype.itemsize         # resident prototypes (tiny)
                 + 2 * N * tile_b * 4                    # double-buffered output block
                 + 3 * tile_b * D * 4                    # in-kernel f32 temporaries
                 + (2 << 20))                            # Mosaic internal headroom
    vmem_bytes = int(min(max(vmem_need, 32 << 20), vmem_cap * 3 // 4))

    in_specs = [
        pl.BlockSpec((tile_b, D), lambda i: (i, 0)),     # streamed x slab
        # NOTE: prototypes are resident & tiny relative to the x stream; the second
        # pipeline buffer (2*N*D bytes) is negligible here, so we skip pl.Buffered(1).
        pl.BlockSpec((N, D), lambda i: (0, 0)),
    ]
    compiler_params = pltpu.CompilerParams(
        dimension_semantics=("parallel",),
        vmem_limit_bytes=vmem_bytes,
    )

    if transposed_out:
        logits_t = pl.pallas_call(
            _kernel_transposed,
            out_shape=jax.ShapeDtypeStruct((N, B), jnp.float32),
            grid_spec=pltpu.PrefetchScalarGridSpec(
                num_scalar_prefetch=0,
                grid=(grid_b,),
                in_specs=in_specs,
                out_specs=pl.BlockSpec((N, tile_b), lambda i: (0, i)),
            ),
            compiler_params=compiler_params,
        )(x, pn)
        return logits_t.T                          # tiny [N, B] -> [B, N]

    return pl.pallas_call(
        _kernel_direct,
        out_shape=jax.ShapeDtypeStruct((B, N), jnp.float32),
        grid_spec=pltpu.PrefetchScalarGridSpec(
            num_scalar_prefetch=0,
            grid=(grid_b,),
            in_specs=in_specs,
            out_specs=pl.BlockSpec((tile_b, N), lambda i: (i, 0)),
        ),
        compiler_params=compiler_params,
    )(x, pn)


# ----------------------------- reference & demo ----------------------------- #

def _reference(x, proto, temp):
    x = x.astype(jnp.float32)
    proto = proto.astype(jnp.float32)
    xn = x / jnp.maximum(jnp.linalg.norm(x, axis=-1, keepdims=True), _EPS)
    pn = proto / jnp.maximum(jnp.linalg.norm(proto, axis=-1, keepdims=True), _EPS)
    return temp * (xn @ pn.T)


if __name__ == "__main__":
    key = jax.random.PRNGKey(0)
    keys = jax.random.split(key, 6)

    def kaiming_uniform_proto(k, n_way, in_dim):
        # kaiming_uniform_(a=sqrt(5)): gain=sqrt(1/3), bound=gain*sqrt(3/fan_in)=1/sqrt(in_dim)
        bound = 1.0 / math.sqrt(in_dim)
        return jax.random.uniform(k, (n_way, in_dim), jnp.float32, -bound, bound)

    temp = 10.0   # metric == 'cos' -> learnable temperature initialized to 10.0

    # 1) few-shot config (small n_way): lane-dense transposed-output path, single block.
    x1 = jax.random.normal(keys[0], (16, 32), jnp.float32)
    p1 = kaiming_uniform_proto(keys[1], 8, 32)
    o1 = cosine_classifier(x1, p1, temp)
    jax.block_until_ready(o1)
    assert o1.shape == (16, 8)
    assert jnp.allclose(o1, _reference(x1, p1, temp), atol=1e-4, rtol=1e-4)

    # 2) many-way config, batch not tile-aligned: direct [tile_b, N] path,
    #    non-divisible grid (masked trailing block, no wrapper-side padding).
    x2 = jax.random.normal(keys[2], (300, 64), jnp.float32)
    p2 = kaiming_uniform_proto(keys[3], 128, 64)
    o2 = cosine_classifier(x2, p2, temp)
    jax.block_until_ready(o2)
    assert o2.shape == (300, 128)
    assert jnp.allclose(o2, _reference(x2, p2, temp), atol=1e-4, rtol=1e-4)

    # 3) bf16 features streamed straight to the MXU, 2-step grid, masked edge block.
    x3 = jax.random.normal(keys[4], (200, 32), jnp.float32).astype(jnp.bfloat16)
    p3 = kaiming_uniform_proto(keys[5], 8, 32)
    o3 = cosine_classifier(x3, p3, temp)
    jax.block_until_ready(o3)
    assert o3.shape == (200, 8)
    assert jnp.allclose(o3, _reference(x3.astype(jnp.float32), p3, temp),
                        atol=5e-2, rtol=2e-2)

    print("KERNEL_OK")
</pallas_src>

<mosaic_0001>
module attributes {stable_mosaic.version = 11 : i64} {
  func.func @_kernel_transposed(%arg0: i32, %arg1: memref<16x32xf32, #tpu.memory_space<vmem>>, %arg2: memref<8x32xf32, #tpu.memory_space<vmem>>, %arg3: memref<8x16xf32, #tpu.memory_space<vmem>>) attributes {dimension_semantics = [#tpu.dimension_semantics<parallel>], iteration_bounds = array<i64: 1>, scalar_prefetch = 0 : i64, scratch_operands = 0 : i64, tpu.core_type = #tpu.core_type<tc>, window_params = [{transform_indices = @transform_0, window_bounds = array<i64: 16, 32>}, {pipeline_mode = #tpu.pipeline_mode<synchronous>, transform_indices = @transform_1, window_bounds = array<i64: 8, 32>}, {transform_indices = @transform_2, window_bounds = array<i64: 8, 16>}]} {
    %c0 = arith.constant 0 : index
    %c0_0 = arith.constant 0 : index
    %0 = vector.load %arg1[%c0, %c0_0] : memref<16x32xf32, #tpu.memory_space<vmem>>, vector<16x32xf32>
    %c0_1 = arith.constant 0 : index
    %c0_2 = arith.constant 0 : index
    %1 = vector.load %arg2[%c0_1, %c0_2] : memref<8x32xf32, #tpu.memory_space<vmem>>, vector<8x32xf32>
    %2 = arith.mulf %0, %0 : vector<16x32xf32>
    %cst = arith.constant 1.000000e+00 : f32
    %3 = vector.broadcast %cst : f32 to vector<8x32xf32>
    %cst_3 = arith.constant dense<0.000000e+00> : vector<8x16xf32>
    %4 = tpu.matmul %3, %2, %cst_3 {dimension_numbers = #tpu.dot_dimension_numbers<[1], [1], [0], [0], [0, 0, 1, 0], [], []>} : vector<8x32xf32>, vector<16x32xf32>, vector<8x16xf32> -> vector<8x16xf32>
    %5 = vector.extract_strided_slice %4 {offsets = [0, 0], sizes = [1, 16], strides = [1, 1]} : vector<8x16xf32> to vector<1x16xf32>
    %cst_4 = arith.constant 1.000000e-24 : f32
    %6 = vector.broadcast %cst_4 : f32 to vector<1x16xf32>
    %7 = arith.maximumf %5, %6 : vector<1x16xf32>
    %8 = math.rsqrt %7 : vector<1x16xf32>
    %cst_5 = arith.constant dense<0.000000e+00> : vector<8x16xf32>
    %9 = tpu.matmul %1, %0, %cst_5 {dimension_numbers = #tpu.dot_dimension_numbers<[1], [1], [0], [0], [0, 0, 1, 0], [], []>} : vector<8x32xf32>, vector<16x32xf32>, vector<8x16xf32> -> vector<8x16xf32>
    %10 = vector.broadcast %8 : vector<1x16xf32> to vector<8x16xf32>
    %11 = arith.mulf %9, %10 : vector<8x16xf32>
    %c0_6 = arith.constant 0 : index
    %c0_7 = arith.constant 0 : index
    %12 = vector.load %arg3[%c0_6, %c0_7] : memref<8x16xf32, #tpu.memory_space<vmem>>, vector<8x16xf32>
    tpu.vector_store %arg3[%c0_6, %c0_7], %11 {strides = array<i32>} : memref<8x16xf32, #tpu.memory_space<vmem>>, vector<8x16xf32>,
    return
  }
  func.func @transform_0(%arg0: i32) -> (i32, i32) {
    %c0_i32 = arith.constant 0 : i32
    %c0_i32_0 = arith.constant 0 : i32
    return %arg0, %c0_i32 : i32, i32
  }
  func.func @transform_1(%arg0: i32) -> (i32, i32) {
    %c0_i32 = arith.constant 0 : i32
    %c0_i32_0 = arith.constant 0 : i32
    %c0_i32_1 = arith.constant 0 : i32
    return %c0_i32, %c0_i32_0 : i32, i32
  }
  func.func @transform_2(%arg0: i32) -> (i32, i32) {
    %c0_i32 = arith.constant 0 : i32
    %c0_i32_0 = arith.constant 0 : i32
    return %c0_i32, %arg0 : i32, i32
  }
}

</mosaic_0001>

<bundles_post_ra>
// kernel: tpu_custom_call.1
= control target key start
LH: loop header
LB: loop body
LE: loop exit
PB: predicated region body
PF: predicated region fallthrough
CT: control target
= control target key end

     0   :  { %7 = vsyncpa [#allocation3], 0  ;;  %s261_s0 = inlined_call_operand.hbm [shape: f32[16,32], index: 0, kind: input, shape index: {}]   ;;  %s262_s1 = inlined_call_operand.hbm [shape: f32[8,32], index: 1, kind: input, shape index: {}]   ;;  %s263_s2 = inlined_call_operand.hbm [shape: f32[8,16], index: 2, kind: output, shape index: {}]  }
   0x1   :  { %8 = vsyncpa [#allocation6], 0 }
   0x2   :  { %9 = vsyncpa [#allocation4], 0  ;;  %s14_s11 = sshll.u32 %s261_s0, 4  ;;  %s231_s12 = smov [#allocation2]   ;;  %s15_s11 = int_to_ptr.hbm [resolvable:$true] %s14_s11 }
   0x3   :  { %s16_s13 = sshll.u32 %s231_s12, 4  ;;  %s28_s16 = sshll.u32 %s262_s1, 4  ;;  %s17_s13 = int_to_ptr.vmem [resolvable:$true] %s16_s13  ;;  %s29_s16 = int_to_ptr.hbm [resolvable:$true] %s28_s16 }
   0x4   :  { %s232_s17 = smov 128   ;;  %s233_s18 = smov 8  }
   0x5   :  { %22 = dma.hbm_to_vmem [thread:$0]  %s15_s11, 256, %s17_s13, [#allocation3], %s232_s17, %s232_s17, %s233_s18  }
   0x6   :  { %s234_s19 = smov [#allocation5]  }
   0x7   :  { %s30_s20 = sshll.u32 %s234_s19, 4  ;;  %s31_s20 = int_to_ptr.vmem [resolvable:$true] %s30_s20 }
   0x8   :  { %33 = dma.hbm_to_vmem [thread:$0]  %s29_s16, 128, %s31_s20, [#allocation6]  }
   0x9   :  { %225 = dma.done.wait [#allocation3], 256  }
   0xa   :  { %226 = vsyncadd [#allocation3], 4294967040 }
   0xb   :  { %227 = dma.done.wait [#allocation6], 128  }
   0xc   :  { %228 = vsyncadd [#allocation6], 4294967168  ;;  %v43_v0 = vld [vmem:[#allocation2 + $0x8] sm:$0xff]  ;;  %vm47_vm0 = vcmask 261120   ;;  %v42_v1 = vld [vmem:[#allocation2] sm:$0xff]  ;;  %v235_v5 = vmov 1.0  }
   0xd   :  { %v46_v2 = vmul.f32 %v43_v0, %v43_v0  ;;  %142 = vmatpush.xpose.msk.msra.mxu1 %vm47_vm0, %v43_v0  ;;  %v45_v3 = vmul.f32 %v42_v1, %v42_v1  ;;  %v44_v4 = vld [vmem:[#allocation5] sm:$0xff]  ;;  %s236_s0 = smov [#allocation7]   ;;  %s128_s23 = sshll.u32 %s263_s2, 4  ;;  %vm119_vm4 = vcmask 130048   ;;  %s129_s23 = int_to_ptr.hbm [resolvable:$true] %s128_s23 }
   0xe   :  { %s126_s1 = sshll.u32 %s236_s0, 4  ;;  %s127_s1 = int_to_ptr.vmem [resolvable:$true] %s126_s1 }
   0xf   :  { %139 = vmatpush.xpose.msk.msra.mxu0 %vm47_vm0, %v46_v2 }
  0x11   :  { %143 = vmatpush.xpose.msk.msra.mxu1 %vm47_vm0, %v42_v1 }
  0x13   :  { %140 = vmatpush.xpose.msk.msra.mxu0 %vm47_vm0, %v45_v3 }
  0x14   :  { %144 = vmatmul.msk.f32.vlgmr.msra.gmra.mxu1 %vm47_vm0, %v44_v4 }
  0x16   :  { %141 = vmatmul.msk.f32.vlgmr.msra.gmra.mxu0 %vm47_vm0, %v235_v5 }
  0x91   :  { %v114_v15 = vpop.f32.mrf.mxu1 }
  0x93   :  { %v74_v6 = vpop.f32.mrf.mxu0 }
  0x94   :  { %v77_v7 = vmax.f32 %v74_v6, 1e-24 }
  0x96   :  { %151 = vrsqrt.f32 %v77_v7  ;;  %vm84_vm2 = vweird.f32 %v77_v7 }
  0x9c   :  { %v152_v8 = vpop.eup %151 }
  0x9d   :  { %v79_v9 = vmul.f32 %v152_v8, %v77_v7  ;;  %vm85_vm1 = vweird.f32 %v152_v8 }
  0x9e   :  { %vm86_vm3 = vmor %vm84_vm2, %vm85_vm1 }
  0x9f   :  { %v80_v10 = vmul.f32 %v152_v8, %v79_v9 }
  0xa1   :  { %v81_v11 = vmul.f32 0.5, %v80_v10 }
  0xa3   :  { %v82_v12 = vsub.f32 1.5, %v81_v11 }
  0xa5   :  { %v83_v13 = vmul.f32 %v152_v8, %v82_v12 }
  0xa7   :  { %v87_v14 = vsel %vm86_vm3, %v152_v8, %v83_v13 }
  0xa8   :  { %v117_v16 = vperm.slane %v87_v14, 0 }
  0xaa   :  { %v118_v17 = vmul.f32 %v117_v16, %v114_v15 }
  0xac   :  { %120 = vst.msk [vmem:[#allocation7] sm:$0xff] %vm119_vm4, %v118_v17 }
  0xad   :  { %131 = dma.vmem_to_hbm [thread:$0]  %s127_s1, 128, %s129_s23, [#allocation4]  }
  0xae   :  { %229 = dma.done.wait [#allocation4], 128  }
  0xaf   :  { %230 = vsyncadd [#allocation4], 4294967168 }
  0xb0   :  { %136 = vsyncpa [#allocation3], 1 }
  0xb1   :  { %137 = vsyncpa [#allocation6], 1 }
  0xb2   :  { %138 = vsyncpa [#allocation4], 1 }

</bundles_post_ra>
